<compile_context>
chip_gen: v7x
topology: tpu7x:2x2x1
jax: 0.10.0
libtpu: 0.0.40
codegen_flags: <defaults>
</compile_context>

<pallas_src>
import jax
import jax.numpy as jnp
from jax.experimental import pallas as pl
from jax.experimental.pallas import tpu as pltpu

# Full-precision f32 matmuls everywhere (kernel and reference).
jax.config.update("jax_default_matmul_precision", "highest")


def _round_up(n, m):
    return ((n + m - 1) // m) * m


def _cdiv(a, b):
    return (a + b - 1) // b


def _model_kernel(x_ref, w0_ref, b0_ref, wmid_ref, bmid_ref, w5_ref, b5_ref, o_ref):
    """Fused MLP + (collapsed) Conv1d stack on one batch tile.

    Batch-on-lanes layout: x_ref is [3, TB], activations are [32, TB], weights
    stay in PyTorch [out, in] layout so each layer is W @ H + b[:, None].
    wmid_ref is the stacked [4, 32, 32] block (Linear#2, Conv2, Conv3, Conv4),
    bmid_ref the matching [4, 32, 1] biases.  b5 is a scalar read from SMEM.
    Output is the lane-dense [1, TB] row.
    """
    hp = jax.lax.Precision.HIGHEST
    # Linear(3, 32) + ReLU
    h = jnp.maximum(
        jnp.dot(w0_ref[...], x_ref[...],
                preferred_element_type=jnp.float32, precision=hp)
        + b0_ref[...], 0.0)
    # Linear(32,32) + 3x Conv1d-as-GEMM, each followed by ReLU (static unroll).
    for i in range(4):
        h = jnp.maximum(
            jnp.dot(wmid_ref[i], h,
                    preferred_element_type=jnp.float32, precision=hp)
            + bmid_ref[i], 0.0)
    # Linear(32, 1) + sigmoid -> lane-dense [1, TB] store.
    z = jnp.dot(w5_ref[...], h,
                preferred_element_type=jnp.float32, precision=hp) + b5_ref[0, 0]
    o_ref[...] = jax.nn.sigmoid(z)


def init_params(key):
    """Deterministic params with PyTorch-default-style uniform(-1/sqrt(fan_in)) init.

    Weights kept in PyTorch layout: Linear [out,in], Conv1d [out,in,k].
    """
    ks = jax.random.split(key, 12)

    def u(k, shape, fan_in):
        bound = 1.0 / jnp.sqrt(fan_in)
        return jax.random.uniform(k, shape, jnp.float32, -bound, bound)

    w0, b0 = u(ks[0], (32, 3), 3.0),   u(ks[1], (32,), 3.0)
    w1, b1 = u(ks[2], (32, 32), 32.0), u(ks[3], (32,), 32.0)
    cw2, cb2 = u(ks[4], (32, 16, 2), 32.0), u(ks[5], (32,), 32.0)
    cw3, cb3 = u(ks[6], (32, 16, 2), 32.0), u(ks[7], (32,), 32.0)
    cw4, cb4 = u(ks[8], (32, 16, 2), 32.0), u(ks[9], (32,), 32.0)
    w5, b5 = u(ks[10], (1, 32), 32.0), u(ks[11], (1,), 32.0)
    return (w0, b0, w1, b1, cw2, cb2, cw3, cb3, cw4, cb4, w5, b5)


def pack_params(params):
    """One-time prep: reshape to lane-major GEMM layout and stack the 32x32 layers.

    No transposes needed: with batch-on-lanes activations the PyTorch [out,in]
    weight layout is already the left-operand layout.
    """
    (w0, b0, w1, b1, cw2, cb2, cw3, cb3, cw4, cb4, w5, b5) = params
    # torch Conv1d weight [out, in, k] -> flat [out, in*k]; flat index c*2+k
    # matches x.view(-1, 16, 2) flattening order.
    mids_w = jnp.stack([w1,
                        cw2.reshape(32, 32),
                        cw3.reshape(32, 32),
                        cw4.reshape(32, 32)])      # [4, 32, 32]
    mids_b = jnp.stack([b1.reshape(32, 1),
                        cb2.reshape(32, 1),
                        cb3.reshape(32, 1),
                        cb4.reshape(32, 1)])       # [4, 32, 1]
    return (w0, b0.reshape(32, 1), mids_w, mids_b, w5, b5.reshape(1, 1))


def custom_model_forward(x, packed, *, tb=4096):
    """Batch-tiled fused forward.  `packed` is the output of pack_params()."""
    w0, b0_c, mids_w, mids_b, w5, b5_s = packed
    B = x.shape[0]

    # Lane-major layout => tiles must be multiples of 128 on the batch axis.
    tb = _round_up(max(tb, 128), 128)
    B_pad = _round_up(B, 128)
    if B_pad <= 256:
        # Tiny batch: one grid step, nothing worth pipelining.
        TB = B_pad
    else:
        # Target >=4 grid steps (keeps both v7x TensorCores busy on the
        # "parallel" batch axis), capped at tb so the double-buffered x/out
        # tiles stay tiny relative to v7x's 64 MiB physical VMEM.
        TB = min(tb, max(128, _round_up(_cdiv(B_pad, 4), 128)))
    B_pad = _round_up(B_pad, TB)

    # Pad batch (zeros only see bias+sigmoid and are sliced off) then flip to
    # batch-on-lanes: x_t is [3, B_pad].
    if B_pad != B:
        x = jnp.pad(x, ((0, B_pad - B), (0, 0)))
    x_t = x.T

    grid = (B_pad // TB,)

    out = pl.pallas_call(
        _model_kernel,
        out_shape=jax.ShapeDtypeStruct((1, B_pad), jnp.float32),
        grid_spec=pltpu.PrefetchScalarGridSpec(
            num_scalar_prefetch=0,
            grid=grid,
            in_specs=[
                # streamed batch tile, batch on lanes
                pl.BlockSpec((3, TB), lambda i: (0, i)),
                # weights/biases: constant index_map -> resident across all tiles
                pl.BlockSpec((32, 3), lambda i: (0, 0)),
                pl.BlockSpec((32, 1), lambda i: (0, 0)),
                pl.BlockSpec((4, 32, 32), lambda i: (0, 0, 0)),
                pl.BlockSpec((4, 32, 1), lambda i: (0, 0, 0)),
                pl.BlockSpec((1, 32), lambda i: (0, 0)),
                # scalar output bias lives in SMEM (no padded VMEM tile)
                pl.BlockSpec(memory_space=pltpu.MemorySpace.SMEM),
            ],
            out_specs=pl.BlockSpec((1, TB), lambda i: (0, i)),
        ),
        compiler_params=pltpu.CompilerParams(
            dimension_semantics=("parallel",),      # megacore-shard the batch axis (v7x)
            vmem_limit_bytes=32 << 20,              # safe on v5e/v6e/v7x
        ),
    )(x_t, w0, b0_c, mids_w, mids_b, w5, b5_s)

    return out[0, :B].reshape(B, 1)


def reference_forward(x, params):
    """Plain-JAX reference mirroring the PyTorch forward exactly."""
    (w0, b0, w1, b1, cw2, cb2, cw3, cb3, cw4, cb4, w5, b5) = params
    h = jax.nn.relu(x @ w0.T + b0)
    h = jax.nn.relu(h @ w1.T + b1)

    def conv_block(h, cw, cb):
        v = h.reshape(-1, 16, 2)                       # x.view(-1, 16, 2)
        out = jnp.einsum('bck,ock->bo', v, cw) + cb    # Conv1d, L_out = 1
        return jax.nn.relu(out)                        # [B, 32]

    h = conv_block(h, cw2, cb2)
    h = conv_block(h, cw3, cb3)
    h = conv_block(h, cw4, cb4)
    return jax.nn.sigmoid(h @ w5.T + b5)               # [B, 1]


if __name__ == "__main__":
    key = jax.random.PRNGKey(0)
    k_x, k_x2, k_x3, k_p = jax.random.split(key, 4)

    params = init_params(k_p)
    packed = pack_params(params)    # one-time weight prep (hoisted out of forward)

    # Small sanity check (single grid step, TB = 128).
    B = 8
    x = jax.random.normal(k_x, (B, 3), jnp.float32)
    out = jax.block_until_ready(custom_model_forward(x, packed))
    ref = reference_forward(x, params)
    assert out.shape == (B, 1)
    assert jnp.allclose(out, ref, atol=1e-5, rtol=1e-5), (out, ref)

    # Multi-tile check: B not divisible by the tile exercises grid + padding +
    # weight residency across grid steps (B_pad=384 -> 3 steps of 128).
    B2 = 300
    x2 = jax.random.normal(k_x2, (B2, 3), jnp.float32)
    out2 = jax.block_until_ready(custom_model_forward(x2, packed))
    ref2 = reference_forward(x2, params)
    assert out2.shape == (B2, 1)
    assert jnp.allclose(out2, ref2, atol=1e-5, rtol=1e-5)

    # Larger batch with a user-supplied tile cap (B_pad=1024 -> 4 steps of 256).
    B3 = 1000
    x3 = jax.random.normal(k_x3, (B3, 3), jnp.float32)
    out3 = jax.block_until_ready(custom_model_forward(x3, packed, tb=256))
    ref3 = reference_forward(x3, params)
    assert out3.shape == (B3, 1)
    assert jnp.allclose(out3, ref3, atol=1e-5, rtol=1e-5)

    print("KERNEL_OK")
</pallas_src>

<mosaic_0001>
module attributes {stable_mosaic.version = 11 : i64} {
  func.func @_model_kernel(%arg0: i32, %arg1: memref<3x128xf32, #tpu.memory_space<vmem>>, %arg2: memref<32x3xf32, #tpu.memory_space<vmem>>, %arg3: memref<32x1xf32, #tpu.memory_space<vmem>>, %arg4: memref<4x32x32xf32, #tpu.memory_space<vmem>>, %arg5: memref<4x32x1xf32, #tpu.memory_space<vmem>>, %arg6: memref<1x32xf32, #tpu.memory_space<vmem>>, %arg7: memref<1x1xf32, #tpu.memory_space<smem>>, %arg8: memref<1x128xf32, #tpu.memory_space<vmem>>) attributes {dimension_semantics = [#tpu.dimension_semantics<parallel>], iteration_bounds = array<i64: 1>, scalar_prefetch = 0 : i64, scratch_operands = 0 : i64, tpu.core_type = #tpu.core_type<tc>, window_params = [{transform_indices = @transform_0, window_bounds = array<i64: 3, 128>}, {pipeline_mode = #tpu.pipeline_mode<synchronous>, transform_indices = @transform_1, window_bounds = array<i64: 32, 3>}, {pipeline_mode = #tpu.pipeline_mode<synchronous>, transform_indices = @transform_2, window_bounds = array<i64: 32, 1>}, {pipeline_mode = #tpu.pipeline_mode<synchronous>, transform_indices = @transform_3, window_bounds = array<i64: 4, 32, 32>}, {pipeline_mode = #tpu.pipeline_mode<synchronous>, transform_indices = @transform_4, window_bounds = array<i64: 4, 32, 1>}, {pipeline_mode = #tpu.pipeline_mode<synchronous>, transform_indices = @transform_5, window_bounds = array<i64: 1, 32>}, {transform_indices = @transform_6, window_bounds = array<i64: 1, 1>}, {transform_indices = @transform_7, window_bounds = array<i64: 1, 128>}]} {
    %c0 = arith.constant 0 : index
    %c0_0 = arith.constant 0 : index
    %0 = vector.load %arg2[%c0, %c0_0] : memref<32x3xf32, #tpu.memory_space<vmem>>, vector<32x3xf32>
    %c0_1 = arith.constant 0 : index
    %c0_2 = arith.constant 0 : index
    %1 = vector.load %arg1[%c0_1, %c0_2] : memref<3x128xf32, #tpu.memory_space<vmem>>, vector<3x128xf32>
    %cst = arith.constant dense<0.000000e+00> : vector<32x128xf32>
    %2 = tpu.matmul %0, %1, %cst {dimension_numbers = #tpu.dot_dimension_numbers<[1], [0], [0], [1], [0, 0, 1, 1], [], []>, precision = #tpu.contract_precision<fp32>} : vector<32x3xf32>, vector<3x128xf32>, vector<32x128xf32> -> vector<32x128xf32>
    %c0_3 = arith.constant 0 : index
    %c0_4 = arith.constant 0 : index
    %3 = vector.load %arg3[%c0_3, %c0_4] : memref<32x1xf32, #tpu.memory_space<vmem>>, vector<32x1xf32>
    %4 = vector.broadcast %3 : vector<32x1xf32> to vector<32x128xf32>
    %5 = arith.addf %2, %4 : vector<32x128xf32>
    %cst_5 = arith.constant 0.000000e+00 : f32
    %6 = vector.broadcast %cst_5 : f32 to vector<32x128xf32>
    %7 = arith.maximumf %5, %6 : vector<32x128xf32>
    %c0_6 = arith.constant 0 : index
    %c0_7 = arith.constant 0 : index
    %c0_8 = arith.constant 0 : index
    %8 = vector.load %arg4[%c0_6, %c0_7, %c0_8] : memref<4x32x32xf32, #tpu.memory_space<vmem>>, vector<1x32x32xf32>
    %9 = vector.shape_cast %8 : vector<1x32x32xf32> to vector<32x32xf32>
    %cst_9 = arith.constant dense<0.000000e+00> : vector<32x128xf32>
    %10 = tpu.matmul %9, %7, %cst_9 {dimension_numbers = #tpu.dot_dimension_numbers<[1], [0], [0], [1], [0, 0, 1, 1], [], []>, precision = #tpu.contract_precision<fp32>} : vector<32x32xf32>, vector<32x128xf32>, vector<32x128xf32> -> vector<32x128xf32>
    %c0_10 = arith.constant 0 : index
    %c0_11 = arith.constant 0 : index
    %c0_12 = arith.constant 0 : index
    %11 = vector.load %arg5[%c0_10, %c0_11, %c0_12] : memref<4x32x1xf32, #tpu.memory_space<vmem>>, vector<1x32x1xf32>
    %12 = vector.shape_cast %11 : vector<1x32x1xf32> to vector<32x1xf32>
    %13 = vector.broadcast %12 : vector<32x1xf32> to vector<32x128xf32>
    %14 = arith.addf %10, %13 : vector<32x128xf32>
    %cst_13 = arith.constant 0.000000e+00 : f32
    %15 = vector.broadcast %cst_13 : f32 to vector<32x128xf32>
    %16 = arith.maximumf %14, %15 : vector<32x128xf32>
    %c1 = arith.constant 1 : index
    %c0_14 = arith.constant 0 : index
    %c0_15 = arith.constant 0 : index
    %17 = vector.load %arg4[%c1, %c0_14, %c0_15] : memref<4x32x32xf32, #tpu.memory_space<vmem>>, vector<1x32x32xf32>
    %18 = vector.shape_cast %17 : vector<1x32x32xf32> to vector<32x32xf32>
    %cst_16 = arith.constant dense<0.000000e+00> : vector<32x128xf32>
    %19 = tpu.matmul %18, %16, %cst_16 {dimension_numbers = #tpu.dot_dimension_numbers<[1], [0], [0], [1], [0, 0, 1, 1], [], []>, precision = #tpu.contract_precision<fp32>} : vector<32x32xf32>, vector<32x128xf32>, vector<32x128xf32> -> vector<32x128xf32>
    %c1_17 = arith.constant 1 : index
    %c0_18 = arith.constant 0 : index
    %c0_19 = arith.constant 0 : index
    %20 = vector.load %arg5[%c1_17, %c0_18, %c0_19] : memref<4x32x1xf32, #tpu.memory_space<vmem>>, vector<1x32x1xf32>
    %21 = vector.shape_cast %20 : vector<1x32x1xf32> to vector<32x1xf32>
    %22 = vector.broadcast %21 : vector<32x1xf32> to vector<32x128xf32>
    %23 = arith.addf %19, %22 : vector<32x128xf32>
    %cst_20 = arith.constant 0.000000e+00 : f32
    %24 = vector.broadcast %cst_20 : f32 to vector<32x128xf32>
    %25 = arith.maximumf %23, %24 : vector<32x128xf32>
    %c2 = arith.constant 2 : index
    %c0_21 = arith.constant 0 : index
    %c0_22 = arith.constant 0 : index
    %26 = vector.load %arg4[%c2, %c0_21, %c0_22] : memref<4x32x32xf32, #tpu.memory_space<vmem>>, vector<1x32x32xf32>
    %27 = vector.shape_cast %26 : vector<1x32x32xf32> to vector<32x32xf32>
    %cst_23 = arith.constant dense<0.000000e+00> : vector<32x128xf32>
    %28 = tpu.matmul %27, %25, %cst_23 {dimension_numbers = #tpu.dot_dimension_numbers<[1], [0], [0], [1], [0, 0, 1, 1], [], []>, precision = #tpu.contract_precision<fp32>} : vector<32x32xf32>, vector<32x128xf32>, vector<32x128xf32> -> vector<32x128xf32>
    %c2_24 = arith.constant 2 : index
    %c0_25 = arith.constant 0 : index
    %c0_26 = arith.constant 0 : index
    %29 = vector.load %arg5[%c2_24, %c0_25, %c0_26] : memref<4x32x1xf32, #tpu.memory_space<vmem>>, vector<1x32x1xf32>
    %30 = vector.shape_cast %29 : vector<1x32x1xf32> to vector<32x1xf32>
    %31 = vector.broadcast %30 : vector<32x1xf32> to vector<32x128xf32>
    %32 = arith.addf %28, %31 : vector<32x128xf32>
    %cst_27 = arith.constant 0.000000e+00 : f32
    %33 = vector.broadcast %cst_27 : f32 to vector<32x128xf32>
    %34 = arith.maximumf %32, %33 : vector<32x128xf32>
    %c3 = arith.constant 3 : index
    %c0_28 = arith.constant 0 : index
    %c0_29 = arith.constant 0 : index
    %35 = vector.load %arg4[%c3, %c0_28, %c0_29] : memref<4x32x32xf32, #tpu.memory_space<vmem>>, vector<1x32x32xf32>
    %36 = vector.shape_cast %35 : vector<1x32x32xf32> to vector<32x32xf32>
    %cst_30 = arith.constant dense<0.000000e+00> : vector<32x128xf32>
    %37 = tpu.matmul %36, %34, %cst_30 {dimension_numbers = #tpu.dot_dimension_numbers<[1], [0], [0], [1], [0, 0, 1, 1], [], []>, precision = #tpu.contract_precision<fp32>} : vector<32x32xf32>, vector<32x128xf32>, vector<32x128xf32> -> vector<32x128xf32>
    %c3_31 = arith.constant 3 : index
    %c0_32 = arith.constant 0 : index
    %c0_33 = arith.constant 0 : index
    %38 = vector.load %arg5[%c3_31, %c0_32, %c0_33] : memref<4x32x1xf32, #tpu.memory_space<vmem>>, vector<1x32x1xf32>
    %39 = vector.shape_cast %38 : vector<1x32x1xf32> to vector<32x1xf32>
    %40 = vector.broadcast %39 : vector<32x1xf32> to vector<32x128xf32>
    %41 = arith.addf %37, %40 : vector<32x128xf32>
    %cst_34 = arith.constant 0.000000e+00 : f32
    %42 = vector.broadcast %cst_34 : f32 to vector<32x128xf32>
    %43 = arith.maximumf %41, %42 : vector<32x128xf32>
    %c0_35 = arith.constant 0 : index
    %c0_36 = arith.constant 0 : index
    %44 = vector.load %arg6[%c0_35, %c0_36] : memref<1x32xf32, #tpu.memory_space<vmem>>, vector<1x32xf32>
    %cst_37 = arith.constant dense<0.000000e+00> : vector<1x128xf32>
    %45 = tpu.matmul %44, %43, %cst_37 {dimension_numbers = #tpu.dot_dimension_numbers<[1], [0], [0], [1], [0, 0, 1, 1], [], []>, precision = #tpu.contract_precision<fp32>} : vector<1x32xf32>, vector<32x128xf32>, vector<1x128xf32> -> vector<1x128xf32>
    %c0_38 = arith.constant 0 : index
    %c0_39 = arith.constant 0 : index
    %46 = memref.load %arg7[%c0_38, %c0_39] : memref<1x1xf32, #tpu.memory_space<smem>>
    %47 = vector.broadcast %46 : f32 to vector<1x128xf32>
    %48 = arith.addf %45, %47 : vector<1x128xf32>
    %49 = arith.negf %48 : vector<1x128xf32>
    %50 = math.exp %49 : vector<1x128xf32>
    %cst_40 = arith.constant 1.000000e+00 : f32
    %51 = vector.broadcast %cst_40 : f32 to vector<1x128xf32>
    %52 = arith.addf %51, %50 : vector<1x128xf32>
    %53 = arith.divf %51, %52 : vector<1x128xf32>
    %c0_41 = arith.constant 0 : index
    %c0_42 = arith.constant 0 : index
    %54 = vector.load %arg8[%c0_41, %c0_42] : memref<1x128xf32, #tpu.memory_space<vmem>>, vector<1x128xf32>
    tpu.vector_store %arg8[%c0_41, %c0_42], %53 {strides = array<i32>} : memref<1x128xf32, #tpu.memory_space<vmem>>, vector<1x128xf32>,
    return
  }
  func.func @transform_0(%arg0: i32) -> (i32, i32) {
    %c0_i32 = arith.constant 0 : i32
    %c0_i32_0 = arith.constant 0 : i32
    return %c0_i32, %arg0 : i32, i32
  }
  func.func @transform_1(%arg0: i32) -> (i32, i32) {
    %c0_i32 = arith.constant 0 : i32
    %c0_i32_0 = arith.constant 0 : i32
    %c0_i32_1 = arith.constant 0 : i32
    return %c0_i32, %c0_i32_0 : i32, i32
  }
  func.func @transform_2(%arg0: i32) -> (i32, i32) {
    %c0_i32 = arith.constant 0 : i32
    %c0_i32_0 = arith.constant 0 : i32
    %c0_i32_1 = arith.constant 0 : i32
    return %c0_i32, %c0_i32_0 : i32, i32
  }
  func.func @transform_3(%arg0: i32) -> (i32, i32, i32) {
    %c0_i32 = arith.constant 0 : i32
    %c0_i32_0 = arith.constant 0 : i32
    %c0_i32_1 = arith.constant 0 : i32
    %c0_i32_2 = arith.constant 0 : i32
    return %c0_i32, %c0_i32_0, %c0_i32_1 : i32, i32, i32
  }
  func.func @transform_4(%arg0: i32) -> (i32, i32, i32) {
    %c0_i32 = arith.constant 0 : i32
    %c0_i32_0 = arith.constant 0 : i32
    %c0_i32_1 = arith.constant 0 : i32
    %c0_i32_2 = arith.constant 0 : i32
    return %c0_i32, %c0_i32_0, %c0_i32_1 : i32, i32, i32
  }
  func.func @transform_5(%arg0: i32) -> (i32, i32) {
    %c0_i32 = arith.constant 0 : i32
    %c0_i32_0 = arith.constant 0 : i32
    %c0_i32_1 = arith.constant 0 : i32
    return %c0_i32, %c0_i32_0 : i32, i32
  }
  func.func @transform_6(%arg0: i32) -> (i32, i32) {
    %c0_i32 = arith.constant 0 : i32
    %c0_i32_0 = arith.constant 0 : i32
    %c0_i32_1 = arith.constant 0 : i32
    return %c0_i32, %c0_i32_0 : i32, i32
  }
  func.func @transform_7(%arg0: i32) -> (i32, i32) {
    %c0_i32 = arith.constant 0 : i32
    %c0_i32_0 = arith.constant 0 : i32
    return %c0_i32, %arg0 : i32, i32
  }
}

</mosaic_0001>

<bundles_post_ra>
// kernel: tpu_custom_call.1
= control target key start
LH: loop header
LB: loop body
LE: loop exit
PB: predicated region body
PF: predicated region fallthrough
CT: control target
= control target key end

     0   :  { %vm70_vm0 = vcmask 1042432   ;;  %vm57_vm1 = vcmask 23552   ;;  %v4925_v12 = vmov 0   ;;  %s5497_s0 = inlined_call_operand.vmem [shape: f32[3,128], index: 0, kind: input, shape index: {}]   ;;  %s5498_s1 = inlined_call_operand.vmem [shape: f32[32,3], index: 1, kind: input, shape index: {}]   ;;  %s5499_s2 = inlined_call_operand.vmem [shape: f32[32,1], index: 2, kind: input, shape index: {}]   ;;  %s5500_s3 = inlined_call_operand.vmem [shape: f32[4,32,32], index: 3, kind: input, shape index: {}]   ;;  %s5501_s4 = inlined_call_operand.vmem [shape: f32[4,32,1], index: 4, kind: input, shape index: {}]   ;;  %s5502_s5 = inlined_call_operand.vmem [shape: f32[1,32], index: 5, kind: input, shape index: {}]   ;;  %s5503_s6 = inlined_call_operand.<no memory space> [shape: f32[1,1], index: 6, kind: input, shape index: {}]   ;;  %s5504_s7 = inlined_call_operand.hbm [shape: f32[1,128], index: 7, kind: output, shape index: {}]  }
   0x1   :  { %v32_v0 = vld [vmem:[%s5497_s0] sm:$0x7]  ;;  %v29_v2 = vld [vmem:[%s5498_s1 + $0x8] sm:$0xff]  ;;  %v30_v6 = vld [vmem:[%s5498_s1 + $0x10] sm:$0xff]  ;;  %4895 = vset.pattern.permute.xlu0 %v4925_v12  ;;  %4896 = vset.pattern.permute.xlu1 %v4925_v12 }
   0x2   :  { %v28_v1 = vld [vmem:[%s5498_s1] sm:$0xff]  ;;  %v72_v3 = vsel %vm70_vm0, %v32_v0, 0  ;;  %v62_v5 = vsel %vm57_vm1, %v29_v2, 0  ;;  %v31_v7 = vld [vmem:[%s5498_s1 + $0x18] sm:$0xff]  ;;  %v65_v11 = vsel %vm57_vm1, %v30_v6, 0  ;;  %v35_v14 = vld [vmem:[%s5499_s2 + $0x10] sm:$0xff] }
   0x3   :  { %v59_v4 = vsel %vm57_vm1, %v28_v1, 0  ;;  %v4987_v8 = vand.u32 4294901760, %v72_v3  ;;  %v4991_v10 = vand.u32 4294901760, %v62_v5  ;;  %v33_v13 = vld [vmem:[%s5499_s2] sm:$0xff]  ;;  %v5000_v15 = vand.u32 4294901760, %v65_v11  ;;  %49 = vperm.xlu1 %4896, %v35_v14   ;;  %v34_v21 = vld [vmem:[%s5499_s2 + $0x8] sm:$0xff] }
   0x4   :  { %v4989_v9 = vand.u32 4294901760, %v59_v4  ;;  %v68_v16 = vsel %vm57_vm1, %v31_v7, 0  ;;  %39 = vperm.xlu0 %4895, %v33_v13   ;;  %v36_v22 = vld [vmem:[%s5499_s2 + $0x18] sm:$0xff]  ;;  %v657_v33 = vld [vmem:[%s5501_s4] sm:$0xff]  ;;  %v658_v34 = vld [vmem:[%s5501_s4 + $0x8] sm:$0xff] }
   0x5   :  { %4081 = vmatprep.subr.mxu0 %v4987_v8  ;;  %v5008_v18 = vsub.f32 %v62_v5, %v4991_v10  ;;  %v182_v19 = vsub.f32 %v72_v3, %v4987_v8  ;;  %v5011_v20 = vand.u32 4294901760, %v68_v16  ;;  %v5021_v23 = vsub.f32 %v65_v11, %v5000_v15 }
   0x6   :  { %v5005_v17 = vsub.f32 %v59_v4, %v4989_v9  ;;  %4082 = vmatpush3.msra.mxu0 %v4987_v8 }
   0x7   :  { %v152_v25 = vand.u32 4294901760, %v5008_v18  ;;  %v5025_v26 = vand.u32 4294901760, %v182_v19  ;;  %v5028_v27 = vsub.f32 %v68_v16, %v5011_v20  ;;  %v162_v28 = vand.u32 4294901760, %v5021_v23  ;;  %54 = vperm.xlu1 %4896, %v36_v22  }
   0x8   :  { %v142_v24 = vand.u32 4294901760, %v5005_v17  ;;  %44 = vperm.xlu0 %4895, %v34_v21  }
   0x9   :  { %v153_v30 = vsub.f32 %v5008_v18, %v152_v25  ;;  %v184_v31 = vsub.f32 %v182_v19, %v5025_v26  ;;  %v172_v32 = vand.u32 4294901760, %v5028_v27  ;;  %v163_v35 = vsub.f32 %v5021_v23, %v162_v28 }
   0xa   :  { %v143_v29 = vsub.f32 %v5005_v17, %v142_v24 }
   0xb   :  { %13 = vsyncpa [#allocation4], 0  ;;  %v154_v37 = vand.u32 4294901760, %v153_v30  ;;  %v185_v38 = vand.u32 4294901760, %v184_v31  ;;  %v173_v39 = vsub.f32 %v5028_v27, %v172_v32  ;;  %v164_v40 = vand.u32 4294901760, %v163_v35  ;;  %668 = vperm.xlu1 %4896, %v658_v34   ;;  %v659_v41 = vld [vmem:[%s5501_s4 + $0x10] sm:$0xff] }
   0xc   :  { %v144_v36 = vand.u32 4294901760, %v143_v29  ;;  %663 = vperm.xlu0 %4895, %v657_v33   ;;  %v660_v43 = vld [vmem:[%s5501_s4 + $0x18] sm:$0xff]  ;;  %v3808_v44 = vld [vmem:[%s5501_s4 + $0x20] sm:$0xff]  ;;  %v3809_v45 = vld [vmem:[%s5501_s4 + $0x28] sm:$0xff]  ;;  %vm681_vm2 = vcmask 261120   ;;  %vm4927_vm3 = vmmov 0  }
   0xd   :  { %4089 = vmatprep.subr.mxu0 %v185_v38  ;;  %v174_v42 = vand.u32 4294901760, %v173_v39  ;;  %v3810_v46 = vld [vmem:[%s5501_s4 + $0x30] sm:$0xff]  ;;  %v3811_v47 = vld [vmem:[%s5501_s4 + $0x38] sm:$0xff]  ;;  %v3816_v48 = vld [vmem:[%s5501_s4 + $0x40] sm:$0xff]  ;;  %s4929_s28 = smov [#allocation3]  }
   0xe   :  { %4083 = vmatprep.mubr.f32.mxu0 %v144_v36  ;;  %v3817_v49 = vld [vmem:[%s5501_s4 + $0x48] sm:$0xff]  ;;  %v3818_v50 = vld [vmem:[%s5501_s4 + $0x50] sm:$0xff]  ;;  %v3819_v51 = vld [vmem:[%s5501_s4 + $0x58] sm:$0xff]  ;;  %s3796_s29 = sshll.u32 %s4929_s28, 4  ;;  %s3797_s29 = int_to_ptr.vmem [resolvable:$true] %s3796_s29 }
   0xf   :  { %4084 = vmatmul.mubr.f32.vlgmr.msra.gmra.mrb[0].mxu0 %v154_v37  ;;  %678 = vperm.xlu1 %4896, %v660_v43   ;;  %v3824_v52 = vld [vmem:[%s5501_s4 + $0x60] sm:$0xff]  ;;  %v3825_v53 = vld [vmem:[%s5501_s4 + $0x68] sm:$0xff]  ;;  %v3826_v54 = vld [vmem:[%s5501_s4 + $0x70] sm:$0xff]  ;;  %s4901_s30 = scalar_lea.vmem %s3797_s29, 16  ;;  %s4905_s8 = scalar_lea.vmem %s3797_s29, 32 }
  0x10   :  { %4090 = vmatpush3.msra.mxu0 %v185_v38  ;;  %4086 = vmatprep.mubr.f32.mxu0 %v164_v40  ;;  %v3827_v55 = vld [vmem:[%s5501_s4 + $0x78] sm:$0xff]  ;;  %v653_v56 = vld [vmem:[%s5500_s3] sm:$0xff]  ;;  %v654_v63 = vld [vmem:[%s5500_s3 + $0x8] sm:$0xff]  ;;  %p4902_p0 = scmp.ne.s32.totalorder %s3797_s29, %s4901_s30  ;;  %p4906_p1 = scmp.lt.s32.totalorder %s3797_s29, %s3797_s29 }
  0x11   :  { %4097 = vmatprep.subr.mxu0 %v182_v19  ;;  %673 = vperm.xlu0 %4895, %v659_v41   ;;  %v683_v57 = vsel %vm681_vm2, %v653_v56, 0  ;;  %v655_v0 = vld [vmem:[%s5500_s3 + $0x10] sm:$0xff]  ;;  %v686_v2 = vsel %vm681_vm2, %v654_v63, 0  ;;  %v656_v4 = vld [vmem:[%s5500_s3 + $0x18] sm:$0xff]  ;;  %p4907_p2 = scmp.lt.s32.totalorder %s4905_s8, %s4901_s30 }
  0x12   :  { %v5127_v58 = vand.u32 4294901760, %v683_v57  ;;  %v689_v3 = vsel %vm681_vm2, %v655_v0, 0  ;;  %v5147_v5 = vand.u32 4294901760, %v686_v2 }
  0x13   :  { %4087 = vmatmul.mubr.f32.gmra.mrb[2].mxu0 %v174_v42  ;;  %1329 = vperm.xlu1 %4896, %v3809_v45   ;;  %v5149_v7 = vand.u32 4294901760, %v689_v3  ;;  %p4908_p3 = por %p4907_p2, %p4906_p1 }
  0x14   :  { %4091 = vmatprep.mubr.f32.mxu0 %v4989_v9  ;;  %v5130_v59 = vsub.f32 %v683_v57, %v5127_v58  ;;  %v5153_v13 = vsub.f32 %v686_v2, %v5147_v5 }
  0x15   :  { %1324 = vperm.xlu0 %4895, %v3808_v44   ;;  %p4909_p4 = pnand %p4908_p3, %p4902_p0 }
  0x16   :  { %v765_v60 = vand.u32 4294901760, %v5130_v59 }
  0x17   :  { %4092 = vmatmul.mubr.f32.vlgmr.msra.gmra.mrb[0].mxu0 %v4991_v10  ;;  %1339 = vperm.xlu1 %4896, %v3811_v47  }
  0x18   :  { %4098 = vmatpush3.msra.mxu0 %v182_v19  ;;  %4094 = vmatprep.mubr.f32.mxu0 %v5000_v15  ;;  %v766_v61 = vsub.f32 %v5130_v59, %v765_v60 }
  0x19   :  { %4105 = vmatprep.subr.mxu0 %v4987_v8  ;;  %1334 = vperm.xlu0 %4895, %v3810_v46  }
  0x1a   :  { %v767_v62 = vand.u32 4294901760, %v766_v61 }
  0x1b   :  { %4095 = vmatmul.mubr.f32.gmra.mrb[2].mxu0 %v5011_v20  ;;  %1989 = vperm.xlu1 %4896, %v3817_v49  }
  0x1c   :  { %4099 = vmatprep.mubr.f32.mxu0 %v5005_v17  ;;  %4137 = vmatprep.mubr.f32.mxu1 %v767_v62  ;;  %v5158_v17 = vsub.f32 %v689_v3, %v5149_v7 }
  0x1d   :  { %1984 = vperm.xlu0 %4895, %v3816_v48  }
  0x1e   :  { %v785_v30 = vand.u32 4294901760, %v5158_v17 }
  0x1f   :  { %4100 = vmatmul.mubr.f32.vlgmr.msra.gmra.mrb[0].mxu0 %v5008_v18  ;;  %1999 = vperm.xlu1 %4896, %v3819_v51  }
  0x20   :  { %4106 = vmatpush3.msra.mxu0 %v4987_v8  ;;  %4102 = vmatprep.mubr.f32.mxu0 %v5021_v23  ;;  %v786_v43 = vsub.f32 %v5158_v17, %v785_v30 }
  0x21   :  { %4113 = vmatprep.subr.mxu0 %v5025_v26  ;;  %1994 = vperm.xlu0 %4895, %v3818_v50  }
  0x23   :  { %4103 = vmatmul.mubr.f32.gmra.mrb[2].mxu0 %v5028_v27  ;;  %2649 = vperm.xlu1 %4896, %v3825_v53  }
  0x24   :  { %4107 = vmatprep.mubr.f32.mxu0 %v142_v24  ;;  %v775_v24 = vand.u32 4294901760, %v5153_v13 }
  0x25   :  { %2644 = vperm.xlu0 %4895, %v3824_v52  }
  0x26   :  { %v776_v36 = vsub.f32 %v5153_v13, %v775_v24 }
  0x27   :  { %4108 = vmatmul.mubr.f32.vlgmr.msra.gmra.mrb[0].mxu0 %v152_v25  ;;  %2659 = vperm.xlu1 %4896, %v3827_v55   ;;  %v787_v55 = vand.u32 4294901760, %v786_v43 }
  0x28   :  { %4114 = vmatpush3.msra.mxu0 %v5025_v26  ;;  %4110 = vmatprep.mubr.f32.mxu0 %v162_v28  ;;  %v777_v49 = vand.u32 4294901760, %v776_v36 }
  0x29   :  { %4121 = vmatprep.subr.mxu0 %v4987_v8  ;;  %2654 = vperm.xlu0 %4895, %v3826_v54  }
  0x2b   :  { %4111 = vmatmul.mubr.f32.gmra.mrb[2].mxu0 %v172_v32 }
  0x2c   :  { %4115 = vmatprep.mubr.f32.mxu0 %v4989_v9 }
  0x2f   :  { %4116 = vmatmul.mubr.f32.vlgmr.msra.gmra.mrb[0].mxu0 %v4991_v10 }
  0x30   :  { %4122 = vmatpush3.msra.mxu0 %v4987_v8  ;;  %4118 = vmatprep.mubr.f32.mxu0 %v5000_v15  ;;  %v692_v8 = vsel %vm681_vm2, %v656_v4, 0 }
  0x33   :  { %4119 = vmatmul.mubr.f32.gmra.mrb[2].mxu0 %v5011_v20 }
  0x34   :  { %4123 = vmatprep.mubr.f32.mxu0 %v4989_v9 }
  0x37   :  { %4124 = vmatmul.mubr.f32.vlgmr.msra.gmra.mrb[0].mxu0 %v4991_v10 }
  0x38   :  { %4126 = vmatprep.mubr.f32.mxu0 %v5000_v15  ;;  %v5155_v15 = vand.u32 4294901760, %v692_v8 }
  0x3a   :  { %v5162_v27 = vsub.f32 %v692_v8, %v5155_v15  ;;  %v3806_v8 = vld [vmem:[%s5500_s3 + $0x30] sm:$0xff] }
  0x3b   :  { %4127 = vmatmul.mubr.f32.gmra.mrb[2].mxu0 %v5011_v20 }
  0x3c   :  { %v795_v39 = vand.u32 4294901760, %v5162_v27 }
  0x3e   :  { %v796_v53 = vsub.f32 %v5162_v27, %v795_v39 }
  0x40   :  { %v797_v0 = vand.u32 4294901760, %v796_v53 }
  0x82   :  { %v50_v6 = vpop.permute.xlu1 %49 }
  0x83   :  { %v40_v1 = vpop.permute.xlu0 %39 }
  0x86   :  { %v55_v18 = vpop.permute.xlu1 %54 }
  0x87   :  { %v45_v9 = vpop.permute.xlu0 %44 }
 0x10a   :  { %v4125_v10 = vpop.f32.mrb[0].mxu0 }
 0x10b   :  { %v4759_v11 = vadd.f32 %v4125_v10, %v45_v9  ;;  %v627_v12 = vpop.f32.mrb[1].mxu0  ;;  %v1349_v10 = vsel %vm681_vm2, %v3806_v8, 0 }
 0x10c   :  { %v4760_v14 = vadd.f32 %v627_v12, %v40_v1 }
 0x10d   :  { %v650_v16 = vmax.f32 %v4759_v11, 0.0  ;;  %v3807_v11 = vld [vmem:[%s5500_s3 + $0x38] sm:$0xff] }
 0x10e   :  { %v649_v19 = vmax.f32 %v4760_v14, 0.0  ;;  %v4128_v20 = vpop.f32.mrb[2].mxu0  ;;  %v664_v14 = vpop.permute.xlu0 %663 }
 0x10f   :  { %v698_v21 = vand.u32 4294901760, %v650_v16  ;;  %v4761_v22 = vadd.f32 %v4128_v20, %v55_v18  ;;  %v639_v23 = vpop.f32.mrb[3].mxu0 }
 0x110   :  { %v695_v25 = vand.u32 4294901760, %v649_v19  ;;  %v4762_v26 = vadd.f32 %v639_v23, %v50_v6 }
 0x111   :  { %v812_v28 = vsub.f32 %v650_v16, %v698_v21  ;;  %v652_v29 = vmax.f32 %v4761_v22, 0.0  ;;  %v1352_v16 = vsel %vm681_vm2, %v3807_v11, 0 }
 0x112   :  { %v5165_v31 = vpack.c.bf16 %v698_v21, %v695_v25  ;;  %v805_v32 = vsub.f32 %v649_v19, %v695_v25  ;;  %v651_v33 = vmax.f32 %v4762_v26, 0.0  ;;  %v5235_v22 = vand.u32 4294901760, %v1352_v16 }
 0x113   :  { %v813_v34 = vand.u32 4294901760, %v812_v28  ;;  %v704_v35 = vand.u32 4294901760, %v652_v29 }
 0x114   :  { %v806_v37 = vand.u32 4294901760, %v805_v32  ;;  %v701_v38 = vand.u32 4294901760, %v651_v33  ;;  %4532 = vmatprep.subr.bf16.mxu1 %v5165_v31  ;;  %v4547_v40 = vpack.c.bf16 %v812_v28, %v805_v32 }
 0x115   :  { %v826_v41 = vsub.f32 %v652_v29, %v704_v35  ;;  %4534 = vmatpush3.bf16.msra.mxu1 %v5165_v31  ;;  %v814_v42 = vsub.f32 %v812_v28, %v813_v34  ;;  %v674_v28 = vpop.permute.xlu0 %673 }
 0x116   :  { %v4535_v44 = vpack.c.bf16 %v704_v35, %v701_v38  ;;  %v819_v45 = vsub.f32 %v651_v33, %v701_v38  ;;  %v807_v46 = vsub.f32 %v805_v32, %v806_v37  ;;  %v4563_v47 = vpack.c.bf16 %v813_v34, %v806_v37 }
 0x117   :  { %v827_v48 = vand.u32 4294901760, %v826_v41  ;;  %v815_v50 = vand.u32 4294901760, %v814_v42  ;;  %v5242_v35 = vsub.f32 %v1352_v16, %v5235_v22  ;;  %v3814_v16 = vld [vmem:[%s5500_s3 + $0x50] sm:$0xff] }
 0x118   :  { %v820_v51 = vand.u32 4294901760, %v819_v45  ;;  %4536 = vmatprep.subr.bf16.mxu1 %v4535_v44  ;;  %v808_v52 = vand.u32 4294901760, %v807_v46  ;;  %v4551_v54 = vpack.c.bf16 %v826_v41, %v819_v45 }
 0x119   :  { %4538 = vmatpush3.bf16.msra.mxu1 %v4535_v44  ;;  %v828_v56 = vsub.f32 %v826_v41, %v827_v48 }
 0x11a   :  { %v4539_v57 = vpack.c.bf16 %v815_v50, %v808_v52  ;;  %v821_v61 = vsub.f32 %v819_v45, %v820_v51  ;;  %v4567_v62 = vpack.c.bf16 %v827_v48, %v820_v51 }
 0x11b   :  { %v829_v63 = vand.u32 4294901760, %v828_v56 }
 0x11c   :  { %4138 = vmatmul.mubr.f32.vlgmr.msra.gmra.mrb[0].mxu1 %v777_v49  ;;  %4540 = vmatprep.subr.bf16.mxu1 %v4539_v57  ;;  %v822_v1 = vand.u32 4294901760, %v821_v61 }
 0x11d   :  { %4542 = vmatpush3.bf16.msra.mxu1 %v4539_v57  ;;  %4140 = vmatprep.mubr.f32.mxu1 %v787_v55 }
 0x11e   :  { %v4543_v2 = vpack.c.bf16 %v829_v63, %v822_v1 }
 0x120   :  { %4141 = vmatmul.mubr.f32.gmra.mrb[2].mxu1 %v797_v0  ;;  %4544 = vmatprep.subr.bf16.mxu1 %v4543_v2 }
 0x121   :  { %4546 = vmatpush3.bf16.msra.mxu1 %v4543_v2  ;;  %4151 = vmatprep.mubr.f32.mxu1 %v5127_v58 }
 0x122   :  { %4548 = vmatprep.subr.bf16.mxu1 %v4547_v40 }
 0x124   :  { %4152 = vmatmul.mubr.f32.vlgmr.msra.gmra.mrb[0].mxu1 %v5147_v5 }
 0x125   :  { %4550 = vmatpush3.bf16.msra.mxu1 %v4547_v40  ;;  %4154 = vmatprep.mubr.f32.mxu1 %v5149_v7 }
 0x126   :  { %4552 = vmatprep.subr.bf16.mxu1 %v4551_v54 }
 0x128   :  { %4155 = vmatmul.mubr.f32.gmra.mrb[2].mxu1 %v5155_v15 }
 0x129   :  { %4554 = vmatpush3.bf16.msra.mxu1 %v4551_v54  ;;  %4165 = vmatprep.mubr.f32.mxu1 %v5130_v59  ;;  %v3804_v59 = vld [vmem:[%s5500_s3 + $0x20] sm:$0xff] }
 0x12a   :  { %4556 = vmatprep.subr.bf16.mxu1 %v5165_v31 }
 0x12c   :  { %4166 = vmatmul.mubr.f32.vlgmr.msra.gmra.mrb[0].mxu1 %v5153_v13  ;;  %v669_v13 = vpop.permute.xlu1 %668 }
 0x12d   :  { %4558 = vmatpush3.bf16.msra.mxu1 %v5165_v31  ;;  %4168 = vmatprep.mubr.f32.mxu1 %v5158_v17 }
 0x12e   :  { %4560 = vmatprep.subr.bf16.mxu1 %v4535_v44 }
 0x130   :  { %4169 = vmatmul.mubr.f32.gmra.mrb[2].mxu1 %v5162_v27  ;;  %v679_v25 = vpop.permute.xlu1 %678 }
 0x131   :  { %4562 = vmatpush3.bf16.msra.mxu1 %v4535_v44  ;;  %4179 = vmatprep.mubr.f32.mxu1 %v765_v60  ;;  %v1343_v60 = vsel %vm681_vm2, %v3804_v59, 0 }
 0x132   :  { %4564 = vmatprep.subr.bf16.mxu1 %v4563_v47  ;;  %v5207_v3 = vand.u32 4294901760, %v1343_v60 }
 0x134   :  { %4180 = vmatmul.mubr.f32.vlgmr.msra.gmra.mrb[0].mxu1 %v775_v24  ;;  %v5210_v4 = vsub.f32 %v1343_v60, %v5207_v3 }
 0x135   :  { %4566 = vmatpush3.bf16.msra.mxu1 %v4563_v47  ;;  %4182 = vmatprep.mubr.f32.mxu1 %v785_v30  ;;  %v1455_v47 = vand.u32 4294901760, %v5242_v35 }
 0x136   :  { %4568 = vmatprep.subr.bf16.mxu1 %v4567_v62  ;;  %v1425_v6 = vand.u32 4294901760, %v5210_v4 }
 0x137   :  { %v1456_v0 = vsub.f32 %v5242_v35, %v1455_v47 }
 0x138   :  { %4183 = vmatmul.mubr.f32.gmra.mrb[2].mxu1 %v795_v39 }
 0x139   :  { %4570 = vmatpush3.bf16.msra.mxu1 %v4567_v62  ;;  %4193 = vmatprep.mubr.f32.mxu1 %v5127_v58  ;;  %v1457_v8 = vand.u32 4294901760, %v1456_v0 }
 0x13a   :  { %4572 = vmatprep.subr.bf16.mxu1 %v5165_v31 }
 0x13c   :  { %4194 = vmatmul.mubr.f32.vlgmr.msra.gmra.mrb[0].mxu1 %v5147_v5 }
 0x13d   :  { %4574 = vmatpush3.bf16.msra.mxu1 %v5165_v31  ;;  %4196 = vmatprep.mubr.f32.mxu1 %v5149_v7 }
 0x13e   :  { %4576 = vmatprep.subr.bf16.mxu1 %v4535_v44 }
 0x140   :  { %4197 = vmatmul.mubr.f32.gmra.mrb[2].mxu1 %v5155_v15 }
 0x141   :  { %4578 = vmatpush3.bf16.msra.mxu1 %v4535_v44  ;;  %4207 = vmatprep.mubr.f32.mxu1 %v5127_v58  ;;  %v1426_v58 = vsub.f32 %v5210_v4, %v1425_v6 }
 0x144   :  { %4208 = vmatmul.mubr.f32.vlgmr.msra.gmra.mrb[0].mxu1 %v5147_v5  ;;  %v1427_v5 = vand.u32 4294901760, %v1426_v58 }
 0x145   :  { %4210 = vmatprep.mubr.f32.mxu1 %v5149_v7  ;;  %v3805_v7 = vld [vmem:[%s5500_s3 + $0x28] sm:$0xff] }
 0x146   :  { %4221 = vmatprep.mubr.f32.mxu0 %v1427_v5  ;;  %v1346_v9 = vsel %vm681_vm2, %v3805_v7, 0 }
 0x147   :  { %v5227_v12 = vand.u32 4294901760, %v1346_v9 }
 0x148   :  { %4211 = vmatmul.mubr.f32.gmra.mrb[2].mxu1 %v5155_v15  ;;  %v5229_v15 = vand.u32 4294901760, %v1349_v10 }
 0x149   :  { %v5233_v20 = vsub.f32 %v1346_v9, %v5227_v12 }
 0x14a   :  { %v5238_v24 = vsub.f32 %v1349_v10, %v5229_v15 }
 0x14b   :  { %v1435_v32 = vand.u32 4294901760, %v5233_v20 }
 0x14c   :  { %v1445_v38 = vand.u32 4294901760, %v5238_v24 }
 0x14d   :  { %v1436_v44 = vsub.f32 %v5233_v20, %v1435_v32 }
 0x14e   :  { %v1446_v51 = vsub.f32 %v5238_v24, %v1445_v38 }
 0x14f   :  { %v1437_v57 = vand.u32 4294901760, %v1436_v44 }
 0x150   :  { %v1447_v2 = vand.u32 4294901760, %v1446_v51 }
 0x217   :  { %v4209_v17 = vpop.f32.mrb[0].mxu1 }
 0x218   :  { %v4763_v18 = vadd.f32 %v4209_v17, %v669_v13  ;;  %v1286_v19 = vpop.f32.mrb[1].mxu1 }
 0x219   :  { %v4764_v21 = vadd.f32 %v1286_v19, %v664_v14  ;;  %v3815_v19 = vld [vmem:[%s5500_s3 + $0x58] sm:$0xff] }
 0x21a   :  { %v1309_v23 = vmax.f32 %v4763_v18, 0.0  ;;  %v2009_v18 = vsel %vm681_vm2, %v3814_v16, 0 }
 0x21b   :  { %v1308_v26 = vmax.f32 %v4764_v21, 0.0  ;;  %v4212_v27 = vpop.f32.mrb[2].mxu1  ;;  %v1330_v21 = vpop.permute.xlu1 %1329 }
 0x21c   :  { %v1358_v29 = vand.u32 4294901760, %v1309_v23  ;;  %v4765_v30 = vadd.f32 %v4212_v27, %v679_v25  ;;  %v1298_v31 = vpop.f32.mrb[3].mxu1 }
 0x21d   :  { %v1355_v33 = vand.u32 4294901760, %v1308_v26  ;;  %v4766_v34 = vadd.f32 %v1298_v31, %v674_v28 }
 0x21e   :  { %v1472_v36 = vsub.f32 %v1309_v23, %v1358_v29  ;;  %v1311_v37 = vmax.f32 %v4765_v30, 0.0  ;;  %v5309_v23 = vand.u32 4294901760, %v2009_v18 }
 0x21f   :  { %v5245_v39 = vpack.c.bf16 %v1358_v29, %v1355_v33  ;;  %v1465_v40 = vsub.f32 %v1308_v26, %v1355_v33  ;;  %v1310_v41 = vmax.f32 %v4766_v34, 0.0  ;;  %v1340_v33 = vpop.permute.xlu1 %1339 }
 0x220   :  { %v1473_v42 = vand.u32 4294901760, %v1472_v36  ;;  %v1364_v43 = vand.u32 4294901760, %v1311_v37 }
 0x221   :  { %v1466_v45 = vand.u32 4294901760, %v1465_v40  ;;  %v1361_v46 = vand.u32 4294901760, %v1310_v41  ;;  %4580 = vmatprep.subr.bf16.mxu0 %v5245_v39  ;;  %v4595_v48 = vpack.c.bf16 %v1472_v36, %v1465_v40 }
 0x222   :  { %v1486_v49 = vsub.f32 %v1311_v37, %v1364_v43  ;;  %4582 = vmatpush3.bf16.msra.mxu0 %v5245_v39  ;;  %v1474_v50 = vsub.f32 %v1472_v36, %v1473_v42 }
 0x223   :  { %v4583_v52 = vpack.c.bf16 %v1364_v43, %v1361_v46  ;;  %v1479_v53 = vsub.f32 %v1310_v41, %v1361_v46  ;;  %v1467_v54 = vsub.f32 %v1465_v40, %v1466_v45  ;;  %v4611_v55 = vpack.c.bf16 %v1473_v42, %v1466_v45 }
 0x224   :  { %v1487_v56 = vand.u32 4294901760, %v1486_v49  ;;  %v1475_v61 = vand.u32 4294901760, %v1474_v50 }
 0x225   :  { %v1480_v62 = vand.u32 4294901760, %v1479_v53  ;;  %4584 = vmatprep.subr.bf16.mxu0 %v4583_v52  ;;  %v1468_v63 = vand.u32 4294901760, %v1467_v54  ;;  %v4599_v1 = vpack.c.bf16 %v1486_v49, %v1479_v53 }
 0x226   :  { %4586 = vmatpush3.bf16.msra.mxu0 %v4583_v52  ;;  %v1488_v59 = vsub.f32 %v1486_v49, %v1487_v56 }
 0x227   :  { %v4587_v60 = vpack.c.bf16 %v1475_v61, %v1468_v63  ;;  %v1481_v58 = vsub.f32 %v1479_v53, %v1480_v62  ;;  %v4615_v5 = vpack.c.bf16 %v1487_v56, %v1480_v62 }
 0x228   :  { %v1489_v7 = vand.u32 4294901760, %v1488_v59 }
 0x229   :  { %4222 = vmatmul.mubr.f32.vlgmr.msra.gmra.mrb[4].mxu0 %v1437_v57  ;;  %4588 = vmatprep.subr.bf16.mxu0 %v4587_v60  ;;  %v1482_v9 = vand.u32 4294901760, %v1481_v58 }
 0x22a   :  { %4590 = vmatpush3.bf16.msra.mxu0 %v4587_v60  ;;  %4224 = vmatprep.mubr.f32.mxu0 %v1447_v2 }
 0x22b   :  { %v4591_v10 = vpack.c.bf16 %v1489_v7, %v1482_v9 }
 0x22d   :  { %4225 = vmatmul.mubr.f32.gmra.mrb[6].mxu0 %v1457_v8  ;;  %4592 = vmatprep.subr.bf16.mxu0 %v4591_v10 }
 0x22e   :  { %4594 = vmatpush3.bf16.msra.mxu0 %v4591_v10  ;;  %4235 = vmatprep.mubr.f32.mxu0 %v5207_v3 }
 0x22f   :  { %4596 = vmatprep.subr.bf16.mxu0 %v4595_v48 }
 0x231   :  { %4236 = vmatmul.mubr.f32.vlgmr.msra.gmra.mrb[4].mxu0 %v5227_v12 }
 0x232   :  { %4598 = vmatpush3.bf16.msra.mxu0 %v4595_v48  ;;  %4238 = vmatprep.mubr.f32.mxu0 %v5229_v15 }
 0x233   :  { %4600 = vmatprep.subr.bf16.mxu0 %v4599_v1 }
 0x235   :  { %4239 = vmatmul.mubr.f32.gmra.mrb[6].mxu0 %v5235_v22 }
 0x236   :  { %4602 = vmatpush3.bf16.msra.mxu0 %v4599_v1  ;;  %4249 = vmatprep.mubr.f32.mxu0 %v5210_v4  ;;  %v3812_v4 = vld [vmem:[%s5500_s3 + $0x40] sm:$0xff] }
 0x237   :  { %4604 = vmatprep.subr.bf16.mxu0 %v5245_v39 }
 0x239   :  { %4250 = vmatmul.mubr.f32.vlgmr.msra.gmra.mrb[4].mxu0 %v5233_v20 }
 0x23a   :  { %4606 = vmatpush3.bf16.msra.mxu0 %v5245_v39  ;;  %4252 = vmatprep.mubr.f32.mxu0 %v5238_v24  ;;  %v2012_v24 = vsel %vm681_vm2, %v3815_v19, 0 }
 0x23b   :  { %4608 = vmatprep.subr.bf16.mxu0 %v4583_v52  ;;  %v5315_v30 = vand.u32 4294901760, %v2012_v24 }
 0x23d   :  { %4253 = vmatmul.mubr.f32.gmra.mrb[6].mxu0 %v5242_v35  ;;  %v5322_v43 = vsub.f32 %v2012_v24, %v5315_v30  ;;  %v3822_v24 = vld [vmem:[%s5500_s3 + $0x70] sm:$0xff] }
 0x23e   :  { %4610 = vmatpush3.bf16.msra.mxu0 %v4583_v52  ;;  %4263 = vmatprep.mubr.f32.mxu0 %v1425_v6  ;;  %v2003_v6 = vsel %vm681_vm2, %v3812_v4, 0 }
 0x23f   :  { %4612 = vmatprep.subr.bf16.mxu0 %v4611_v55  ;;  %v5287_v11 = vand.u32 4294901760, %v2003_v6 }
 0x241   :  { %4264 = vmatmul.mubr.f32.vlgmr.msra.gmra.mrb[4].mxu0 %v1435_v32  ;;  %v5290_v13 = vsub.f32 %v2003_v6, %v5287_v11  ;;  %v5318_v32 = vsub.f32 %v2009_v18, %v5309_v23 }
 0x242   :  { %4614 = vmatpush3.bf16.msra.mxu0 %v4611_v55  ;;  %4266 = vmatprep.mubr.f32.mxu0 %v1445_v38  ;;  %v2115_v55 = vand.u32 4294901760, %v5322_v43 }
 0x243   :  { %4616 = vmatprep.subr.bf16.mxu0 %v4615_v5  ;;  %v2085_v14 = vand.u32 4294901760, %v5290_v13  ;;  %v2105_v46 = vand.u32 4294901760, %v5318_v32 }
 0x244   :  { %v2116_v8 = vsub.f32 %v5322_v43, %v2115_v55 }
 0x245   :  { %4267 = vmatmul.mubr.f32.gmra.mrb[6].mxu0 %v1455_v47  ;;  %v2106_v62 = vsub.f32 %v5318_v32, %v2105_v46 }
 0x246   :  { %4618 = vmatpush3.bf16.msra.mxu0 %v4615_v5  ;;  %4277 = vmatprep.mubr.f32.mxu0 %v5207_v3  ;;  %v2117_v16 = vand.u32 4294901760, %v2116_v8 }
 0x247   :  { %4620 = vmatprep.subr.bf16.mxu0 %v5245_v39  ;;  %v2107_v10 = vand.u32 4294901760, %v2106_v62 }
 0x249   :  { %4278 = vmatmul.mubr.f32.vlgmr.msra.gmra.mrb[4].mxu0 %v5227_v12 }
 0x24a   :  { %4622 = vmatpush3.bf16.msra.mxu0 %v5245_v39  ;;  %4280 = vmatprep.mubr.f32.mxu0 %v5229_v15 }
 0x24b   :  { %4624 = vmatprep.subr.bf16.mxu0 %v4583_v52 }
 0x24d   :  { %4281 = vmatmul.mubr.f32.gmra.mrb[6].mxu0 %v5235_v22 }
 0x24e   :  { %4626 = vmatpush3.bf16.msra.mxu0 %v4583_v52  ;;  %4291 = vmatprep.mubr.f32.mxu0 %v5207_v3  ;;  %v2086_v3 = vsub.f32 %v5290_v13, %v2085_v14 }
 0x251   :  { %4292 = vmatmul.mubr.f32.vlgmr.msra.gmra.mrb[4].mxu0 %v5227_v12  ;;  %v2087_v12 = vand.u32 4294901760, %v2086_v3 }
 0x252   :  { %4294 = vmatprep.mubr.f32.mxu0 %v5229_v15  ;;  %v3813_v15 = vld [vmem:[%s5500_s3 + $0x48] sm:$0xff] }
 0x253   :  { %4305 = vmatprep.mubr.f32.mxu1 %v2087_v12  ;;  %v2006_v17 = vsel %vm681_vm2, %v3813_v15, 0 }
 0x254   :  { %v5307_v20 = vand.u32 4294901760, %v2006_v17 }
 0x255   :  { %4295 = vmatmul.mubr.f32.gmra.mrb[6].mxu0 %v5235_v22  ;;  %v1325_v22 = vpop.permute.xlu0 %1324 }
 0x256   :  { %v5313_v28 = vsub.f32 %v2006_v17, %v5307_v20 }
 0x258   :  { %v2095_v40 = vand.u32 4294901760, %v5313_v28 }
 0x259   :  { %v1335_v36 = vpop.permute.xlu0 %1334 }
 0x25a   :  { %v2096_v52 = vsub.f32 %v5313_v28, %v2095_v40 }
 0x25c   :  { %v2097_v60 = vand.u32 4294901760, %v2096_v52 }
 0x324   :  { %v4293_v25 = vpop.f32.mrb[4].mxu0 }
 0x325   :  { %v4767_v26 = vadd.f32 %v4293_v25, %v1330_v21  ;;  %v1946_v27 = vpop.f32.mrb[5].mxu0 }
 0x326   :  { %v4768_v29 = vadd.f32 %v1946_v27, %v1325_v22  ;;  %v3823_v27 = vld [vmem:[%s5500_s3 + $0x78] sm:$0xff] }
 0x327   :  { %v1969_v31 = vmax.f32 %v4767_v26, 0.0  ;;  %v2669_v26 = vsel %vm681_vm2, %v3822_v24, 0 }
 0x328   :  { %v1968_v34 = vmax.f32 %v4768_v29, 0.0  ;;  %v4296_v35 = vpop.f32.mrb[6].mxu0  ;;  %v1990_v29 = vpop.permute.xlu1 %1989 }
 0x329   :  { %v2018_v37 = vand.u32 4294901760, %v1969_v31  ;;  %v4769_v38 = vadd.f32 %v4296_v35, %v1340_v33  ;;  %v1958_v39 = vpop.f32.mrb[7].mxu0 }
 0x32a   :  { %v2015_v41 = vand.u32 4294901760, %v1968_v34  ;;  %v4770_v42 = vadd.f32 %v1958_v39, %v1335_v36 }
 0x32b   :  { %v2132_v44 = vsub.f32 %v1969_v31, %v2018_v37  ;;  %v1971_v45 = vmax.f32 %v4769_v38, 0.0  ;;  %v5389_v31 = vand.u32 4294901760, %v2669_v26 }
 0x32c   :  { %v5325_v47 = vpack.c.bf16 %v2018_v37, %v2015_v41  ;;  %v2125_v48 = vsub.f32 %v1968_v34, %v2015_v41  ;;  %v1970_v49 = vmax.f32 %v4770_v42, 0.0  ;;  %v2000_v41 = vpop.permute.xlu1 %1999 }
 0x32d   :  { %v2133_v50 = vand.u32 4294901760, %v2132_v44  ;;  %v2024_v51 = vand.u32 4294901760, %v1971_v45 }
 0x32e   :  { %v2126_v53 = vand.u32 4294901760, %v2125_v48  ;;  %v2021_v54 = vand.u32 4294901760, %v1970_v49  ;;  %4628 = vmatprep.subr.bf16.mxu1 %v5325_v47  ;;  %v4643_v56 = vpack.c.bf16 %v2132_v44, %v2125_v48 }
 0x32f   :  { %v2146_v57 = vsub.f32 %v1971_v45, %v2024_v51  ;;  %4630 = vmatpush3.bf16.msra.mxu1 %v5325_v47  ;;  %v2134_v61 = vsub.f32 %v2132_v44, %v2133_v50 }
 0x330   :  { %v4631_v63 = vpack.c.bf16 %v2024_v51, %v2021_v54  ;;  %v2139_v0 = vsub.f32 %v1970_v49, %v2021_v54  ;;  %v2127_v1 = vsub.f32 %v2125_v48, %v2126_v53  ;;  %v4659_v2 = vpack.c.bf16 %v2133_v50, %v2126_v53 }
 0x331   :  { %v2147_v59 = vand.u32 4294901760, %v2146_v57  ;;  %v2135_v58 = vand.u32 4294901760, %v2134_v61 }
 0x332   :  { %v2140_v5 = vand.u32 4294901760, %v2139_v0  ;;  %4632 = vmatprep.subr.bf16.mxu1 %v4631_v63  ;;  %v2128_v7 = vand.u32 4294901760, %v2127_v1  ;;  %v4647_v9 = vpack.c.bf16 %v2146_v57, %v2139_v0 }
 0x333   :  { %4634 = vmatpush3.bf16.msra.mxu1 %v4631_v63  ;;  %v2148_v4 = vsub.f32 %v2146_v57, %v2147_v59 }
 0x334   :  { %v4635_v6 = vpack.c.bf16 %v2135_v58, %v2128_v7  ;;  %v2141_v3 = vsub.f32 %v2139_v0, %v2140_v5  ;;  %v4663_v12 = vpack.c.bf16 %v2147_v59, %v2140_v5 }
 0x335   :  { %v2149_v15 = vand.u32 4294901760, %v2148_v4 }
 0x336   :  { %4306 = vmatmul.mubr.f32.vlgmr.msra.gmra.mrb[4].mxu1 %v2097_v60  ;;  %4636 = vmatprep.subr.bf16.mxu1 %v4635_v6  ;;  %v2142_v17 = vand.u32 4294901760, %v2141_v3 }
 0x337   :  { %4638 = vmatpush3.bf16.msra.mxu1 %v4635_v6  ;;  %4308 = vmatprep.mubr.f32.mxu1 %v2107_v10 }
 0x338   :  { %v4639_v18 = vpack.c.bf16 %v2149_v15, %v2142_v17 }
 0x33a   :  { %4309 = vmatmul.mubr.f32.gmra.mrb[6].mxu1 %v2117_v16  ;;  %4640 = vmatprep.subr.bf16.mxu1 %v4639_v18 }
 0x33b   :  { %4642 = vmatpush3.bf16.msra.mxu1 %v4639_v18  ;;  %4319 = vmatprep.mubr.f32.mxu1 %v5287_v11 }
 0x33c   :  { %4644 = vmatprep.subr.bf16.mxu1 %v4643_v56 }
 0x33e   :  { %4320 = vmatmul.mubr.f32.vlgmr.msra.gmra.mrb[4].mxu1 %v5307_v20 }
 0x33f   :  { %4646 = vmatpush3.bf16.msra.mxu1 %v4643_v56  ;;  %4322 = vmatprep.mubr.f32.mxu1 %v5309_v23 }
 0x340   :  { %4648 = vmatprep.subr.bf16.mxu1 %v4647_v9 }
 0x342   :  { %4323 = vmatmul.mubr.f32.gmra.mrb[6].mxu1 %v5315_v30 }
 0x343   :  { %4650 = vmatpush3.bf16.msra.mxu1 %v4647_v9  ;;  %4333 = vmatprep.mubr.f32.mxu1 %v5290_v13  ;;  %v3820_v13 = vld [vmem:[%s5500_s3 + $0x60] sm:$0xff] }
 0x344   :  { %4652 = vmatprep.subr.bf16.mxu1 %v5325_v47 }
 0x346   :  { %4334 = vmatmul.mubr.f32.vlgmr.msra.gmra.mrb[4].mxu1 %v5313_v28 }
 0x347   :  { %4654 = vmatpush3.bf16.msra.mxu1 %v5325_v47  ;;  %4336 = vmatprep.mubr.f32.mxu1 %v5318_v32  ;;  %v2672_v32 = vsel %vm681_vm2, %v3823_v27, 0  ;;  %v3292_v27 = vld [vmem:[%s5502_s5] sm:$0x1] }
 0x348   :  { %4656 = vmatprep.subr.bf16.mxu1 %v4631_v63  ;;  %v5395_v38 = vand.u32 4294901760, %v2672_v32 }
 0x34a   :  { %4337 = vmatmul.mubr.f32.gmra.mrb[6].mxu1 %v5322_v43  ;;  %v5402_v51 = vsub.f32 %v2672_v32, %v5395_v38 }
 0x34b   :  { %4658 = vmatpush3.bf16.msra.mxu1 %v4631_v63  ;;  %4347 = vmatprep.mubr.f32.mxu1 %v2085_v14  ;;  %v2663_v14 = vsel %vm681_vm2, %v3820_v13, 0 }
 0x34c   :  { %4660 = vmatprep.subr.bf16.mxu1 %v4659_v2  ;;  %v5367_v19 = vand.u32 4294901760, %v2663_v14 }
 0x34e   :  { %4348 = vmatmul.mubr.f32.vlgmr.msra.gmra.mrb[4].mxu1 %v2095_v40  ;;  %v5370_v21 = vsub.f32 %v2663_v14, %v5367_v19  ;;  %v5398_v40 = vsub.f32 %v2669_v26, %v5389_v31 }
 0x34f   :  { %4662 = vmatpush3.bf16.msra.mxu1 %v4659_v2  ;;  %4350 = vmatprep.mubr.f32.mxu1 %v2105_v46  ;;  %v2775_v2 = vand.u32 4294901760, %v5402_v51 }
 0x350   :  { %4664 = vmatprep.subr.bf16.mxu1 %v4663_v12  ;;  %v2745_v22 = vand.u32 4294901760, %v5370_v21  ;;  %v2765_v54 = vand.u32 4294901760, %v5398_v40 }
 0x351   :  { %v2776_v16 = vsub.f32 %v5402_v51, %v2775_v2 }
 0x352   :  { %4351 = vmatmul.mubr.f32.gmra.mrb[6].mxu1 %v2115_v55  ;;  %v2766_v5 = vsub.f32 %v5398_v40, %v2765_v54 }
 0x353   :  { %4666 = vmatpush3.bf16.msra.mxu1 %v4663_v12  ;;  %4361 = vmatprep.mubr.f32.mxu1 %v5287_v11  ;;  %v2777_v24 = vand.u32 4294901760, %v2776_v16  ;;  %v3294_v16 = vstv %s5503_s6 }
 0x354   :  { %4668 = vmatprep.subr.bf16.mxu1 %v5325_v47  ;;  %v2767_v18 = vand.u32 4294901760, %v2766_v5 }
 0x356   :  { %4362 = vmatmul.mubr.f32.vlgmr.msra.gmra.mrb[4].mxu1 %v5307_v20 }
 0x357   :  { %4670 = vmatpush3.bf16.msra.mxu1 %v5325_v47  ;;  %4364 = vmatprep.mubr.f32.mxu1 %v5309_v23 }
 0x358   :  { %4672 = vmatprep.subr.bf16.mxu1 %v4631_v63 }
 0x35a   :  { %4365 = vmatmul.mubr.f32.gmra.mrb[6].mxu1 %v5315_v30 }
 0x35b   :  { %4674 = vmatpush3.bf16.msra.mxu1 %v4631_v63  ;;  %4375 = vmatprep.mubr.f32.mxu1 %v5287_v11  ;;  %v2746_v11 = vsub.f32 %v5370_v21, %v2745_v22 }
 0x35e   :  { %4376 = vmatmul.mubr.f32.vlgmr.msra.gmra.mrb[4].mxu1 %v5307_v20  ;;  %v2747_v20 = vand.u32 4294901760, %v2746_v11 }
 0x35f   :  { %4378 = vmatprep.mubr.f32.mxu1 %v5309_v23  ;;  %v3821_v23 = vld [vmem:[%s5500_s3 + $0x68] sm:$0xff] }
 0x360   :  { %4389 = vmatprep.mubr.f32.mxu0 %v2747_v20  ;;  %v2666_v25 = vsel %vm681_vm2, %v3821_v23, 0 }
 0x361   :  { %v5387_v28 = vand.u32 4294901760, %v2666_v25 }
 0x362   :  { %4379 = vmatmul.mubr.f32.gmra.mrb[6].mxu1 %v5315_v30  ;;  %v1985_v30 = vpop.permute.xlu0 %1984 }
 0x363   :  { %v5393_v36 = vsub.f32 %v2666_v25, %v5387_v28 }
 0x365   :  { %v2755_v48 = vand.u32 4294901760, %v5393_v36 }
 0x366   :  { %v1995_v44 = vpop.permute.xlu0 %1994 }
 0x367   :  { %v2756_v63 = vsub.f32 %v5393_v36, %v2755_v48 }
 0x369   :  { %v2757_v6 = vand.u32 4294901760, %v2756_v63 }
 0x431   :  { %v4377_v33 = vpop.f32.mrb[4].mxu1 }
 0x432   :  { %v4771_v34 = vadd.f32 %v4377_v33, %v1990_v29  ;;  %v2606_v35 = vpop.f32.mrb[5].mxu1 }
 0x433   :  { %v4772_v37 = vadd.f32 %v2606_v35, %v1985_v30  ;;  %v2645_v30 = vpop.permute.xlu0 %2644 }
 0x434   :  { %v2629_v39 = vmax.f32 %v4771_v34, 0.0 }
 0x435   :  { %v2628_v42 = vmax.f32 %v4772_v37, 0.0  ;;  %v4380_v43 = vpop.f32.mrb[6].mxu1 }
 0x436   :  { %v2678_v45 = vand.u32 4294901760, %v2629_v39  ;;  %v4773_v46 = vadd.f32 %v4380_v43, %v2000_v41  ;;  %v2618_v47 = vpop.f32.mrb[7].mxu1 }
 0x437   :  { %v2675_v49 = vand.u32 4294901760, %v2628_v42  ;;  %v4774_v50 = vadd.f32 %v2618_v47, %v1995_v44 }
 0x438   :  { %v2792_v52 = vsub.f32 %v2629_v39, %v2678_v45  ;;  %v2631_v53 = vmax.f32 %v4773_v46, 0.0 }
 0x439   :  { %v5405_v55 = vpack.c.bf16 %v2678_v45, %v2675_v49  ;;  %v2785_v56 = vsub.f32 %v2628_v42, %v2675_v49  ;;  %v2630_v57 = vmax.f32 %v4774_v50, 0.0 }
 0x43a   :  { %v2793_v61 = vand.u32 4294901760, %v2792_v52  ;;  %v2684_v62 = vand.u32 4294901760, %v2631_v53 }
 0x43b   :  { %v2786_v0 = vand.u32 4294901760, %v2785_v56  ;;  %v2681_v1 = vand.u32 4294901760, %v2630_v57  ;;  %4676 = vmatprep.subr.bf16.mxu0 %v5405_v55  ;;  %v4691_v59 = vpack.c.bf16 %v2792_v52, %v2785_v56 }
 0x43c   :  { %v2806_v60 = vsub.f32 %v2631_v53, %v2684_v62  ;;  %4678 = vmatpush3.bf16.msra.mxu0 %v5405_v55  ;;  %v2794_v58 = vsub.f32 %v2792_v52, %v2793_v61 }
 0x43d   :  { %v4679_v7 = vpack.c.bf16 %v2684_v62, %v2681_v1  ;;  %v2799_v8 = vsub.f32 %v2630_v57, %v2681_v1  ;;  %v2787_v9 = vsub.f32 %v2785_v56, %v2786_v0  ;;  %v4707_v10 = vpack.c.bf16 %v2793_v61, %v2786_v0 }
 0x43e   :  { %v2807_v4 = vand.u32 4294901760, %v2806_v60  ;;  %v2795_v3 = vand.u32 4294901760, %v2794_v58 }
 0x43f   :  { %v2800_v12 = vand.u32 4294901760, %v2799_v8  ;;  %4680 = vmatprep.subr.bf16.mxu0 %v4679_v7  ;;  %v2788_v15 = vand.u32 4294901760, %v2787_v9  ;;  %v4695_v17 = vpack.c.bf16 %v2806_v60, %v2799_v8 }
 0x440   :  { %4682 = vmatpush3.bf16.msra.mxu0 %v4679_v7  ;;  %v2808_v13 = vsub.f32 %v2806_v60, %v2807_v4 }
 0x441   :  { %v4683_v14 = vpack.c.bf16 %v2795_v3, %v2788_v15  ;;  %v2801_v11 = vsub.f32 %v2799_v8, %v2800_v12  ;;  %v4711_v20 = vpack.c.bf16 %v2807_v4, %v2800_v12 }
 0x442   :  { %v2809_v23 = vand.u32 4294901760, %v2808_v13 }
 0x443   :  { %4390 = vmatmul.mubr.f32.vlgmr.msra.gmra.mrb[8].mxu0 %v2757_v6  ;;  %4684 = vmatprep.subr.bf16.mxu0 %v4683_v14  ;;  %v2802_v25 = vand.u32 4294901760, %v2801_v11 }
 0x444   :  { %4686 = vmatpush3.bf16.msra.mxu0 %v4683_v14  ;;  %4392 = vmatprep.mubr.f32.mxu0 %v2767_v18 }
 0x445   :  { %v4687_v26 = vpack.c.bf16 %v2809_v23, %v2802_v25 }
 0x447   :  { %4393 = vmatmul.mubr.f32.gmra.mrb[10].mxu0 %v2777_v24  ;;  %4688 = vmatprep.subr.bf16.mxu0 %v4687_v26 }
 0x448   :  { %4690 = vmatpush3.bf16.msra.mxu0 %v4687_v26  ;;  %4403 = vmatprep.mubr.f32.mxu0 %v5367_v19 }
 0x449   :  { %4692 = vmatprep.subr.bf16.mxu0 %v4691_v59 }
 0x44b   :  { %4404 = vmatmul.mubr.f32.vlgmr.msra.gmra.mrb[8].mxu0 %v5387_v28 }
 0x44c   :  { %4694 = vmatpush3.bf16.msra.mxu0 %v4691_v59  ;;  %4406 = vmatprep.mubr.f32.mxu0 %v5389_v31 }
 0x44d   :  { %4696 = vmatprep.subr.bf16.mxu0 %v4695_v17 }
 0x44f   :  { %4407 = vmatmul.mubr.f32.gmra.mrb[10].mxu0 %v5395_v38 }
 0x450   :  { %4698 = vmatpush3.bf16.msra.mxu0 %v4695_v17  ;;  %4417 = vmatprep.mubr.f32.mxu0 %v5370_v21  ;;  %v4926_v21 = vmov 0.0|0.0  }
 0x451   :  { %4700 = vmatprep.subr.bf16.mxu0 %v5405_v55  ;;  %4723 = vmatprep.subr.bf16.mxu1 %v4926_v21 }
 0x453   :  { %4418 = vmatmul.mubr.f32.vlgmr.msra.gmra.mrb[8].mxu0 %v5393_v36 }
 0x454   :  { %4702 = vmatpush3.bf16.msra.mxu0 %v5405_v55  ;;  %4420 = vmatprep.mubr.f32.mxu0 %v5398_v40  ;;  %v2655_v40 = vpop.permute.xlu0 %2654 }
 0x455   :  { %4704 = vmatprep.subr.bf16.mxu0 %v4679_v7 }
 0x457   :  { %4421 = vmatmul.mubr.f32.gmra.mrb[10].mxu0 %v5402_v51 }
 0x458   :  { %4706 = vmatpush3.bf16.msra.mxu0 %v4679_v7  ;;  %4431 = vmatprep.mubr.f32.mxu0 %v2745_v22  ;;  %v4928_v22 = vmov 0.0  }
 0x459   :  { %4708 = vmatprep.subr.bf16.mxu0 %v4707_v10  ;;  %4473 = vmatprep.mubr.msk.f32.mxu1 %vm4927_vm3, %v4928_v22 }
 0x45b   :  { %4432 = vmatmul.mubr.f32.vlgmr.msra.gmra.mrb[8].mxu0 %v2755_v48 }
 0x45c   :  { %4710 = vmatpush3.bf16.msra.mxu0 %v4707_v10  ;;  %4434 = vmatprep.mubr.f32.mxu0 %v2765_v54 }
 0x45d   :  { %4712 = vmatprep.subr.bf16.mxu0 %v4711_v20 }
 0x45f   :  { %4435 = vmatmul.mubr.f32.gmra.mrb[10].mxu0 %v2775_v2 }
 0x460   :  { %4714 = vmatpush3.bf16.msra.mxu0 %v4711_v20  ;;  %4445 = vmatprep.mubr.f32.mxu0 %v5367_v19 }
 0x461   :  { %4716 = vmatprep.subr.bf16.mxu0 %v5405_v55 }
 0x463   :  { %4446 = vmatmul.mubr.f32.vlgmr.msra.gmra.mrb[8].mxu0 %v5387_v28 }
 0x464   :  { %4718 = vmatpush3.bf16.msra.mxu0 %v5405_v55  ;;  %4448 = vmatprep.mubr.f32.mxu0 %v5389_v31 }
 0x465   :  { %4720 = vmatprep.subr.bf16.mxu0 %v4679_v7 }
 0x467   :  { %4449 = vmatmul.mubr.f32.gmra.mrb[10].mxu0 %v5395_v38 }
 0x468   :  { %4722 = vmatpush3.bf16.msra.mxu0 %v4679_v7  ;;  %4459 = vmatprep.mubr.f32.mxu0 %v5367_v19  ;;  %v3296_v19 = vsel %vm681_vm2, %v3292_v27, 0 }
 0x469   :  { %v5450_v29 = vand.u32 4294901760, %v3296_v19 }
 0x46b   :  { %4460 = vmatmul.mubr.f32.vlgmr.msra.gmra.mrb[8].mxu0 %v5387_v28  ;;  %v2650_v28 = vpop.permute.xlu1 %2649  ;;  %v5453_v34 = vsub.f32 %v3296_v19, %v5450_v29 }
 0x46c   :  { %4462 = vmatprep.mubr.f32.mxu0 %v5389_v31 }
 0x46d   :  { %v3369_v44 = vand.u32 4294901760, %v5453_v34 }
 0x46f   :  { %4463 = vmatmul.mubr.f32.gmra.mrb[10].mxu0 %v5395_v38  ;;  %v2660_v37 = vpop.permute.xlu1 %2659  ;;  %v3370_v54 = vsub.f32 %v5453_v34, %v3369_v44 }
 0x471   :  { %v3371_v58 = vand.u32 4294901760, %v3370_v54 }
 0x53e   :  { %v4461_v31 = vpop.f32.mrb[8].mxu0 }
 0x53f   :  { %v4775_v32 = vadd.f32 %v4461_v31, %v2650_v28  ;;  %v3266_v33 = vpop.f32.mrb[9].mxu0 }
 0x540   :  { %v4776_v35 = vadd.f32 %v3266_v33, %v2645_v30 }
 0x541   :  { %v3289_v36 = vmax.f32 %v4775_v32, 0.0 }
 0x542   :  { %v3288_v38 = vmax.f32 %v4776_v35, 0.0  ;;  %v4464_v39 = vpop.f32.mrb[10].mxu0 }
 0x543   :  { %v3302_v41 = vand.u32 4294901760, %v3289_v36  ;;  %v4777_v42 = vadd.f32 %v4464_v39, %v2660_v37  ;;  %v3278_v43 = vpop.f32.mrb[11].mxu0 }
 0x544   :  { %v3299_v45 = vand.u32 4294901760, %v3288_v38  ;;  %v4778_v46 = vadd.f32 %v3278_v43, %v2655_v40 }
 0x545   :  { %v3386_v47 = vsub.f32 %v3289_v36, %v3302_v41  ;;  %v3291_v48 = vmax.f32 %v4777_v42, 0.0 }
 0x546   :  { %v4724_v49 = vpack.c.bf16 %v3302_v41, %v3299_v45  ;;  %v3379_v50 = vsub.f32 %v3288_v38, %v3299_v45  ;;  %v3290_v51 = vmax.f32 %v4778_v46, 0.0 }
 0x547   :  { %v3387_v52 = vand.u32 4294901760, %v3386_v47  ;;  %v3308_v53 = vand.u32 4294901760, %v3291_v48 }
 0x548   :  { %v3380_v55 = vand.u32 4294901760, %v3379_v50  ;;  %v3305_v56 = vand.u32 4294901760, %v3290_v51  ;;  %4725 = vmatpush3.bf16.msra.mxu1 %v4724_v49  ;;  %v4736_v57 = vpack.c.bf16 %v3386_v47, %v3379_v50 }
 0x549   :  { %v3388_v61 = vsub.f32 %v3386_v47, %v3387_v52  ;;  %v3400_v62 = vsub.f32 %v3291_v48, %v3308_v53  ;;  %4726 = vmatprep.subr.bf16.mxu1 %v4926_v21 }
 0x54a   :  { %v3381_v63 = vsub.f32 %v3379_v50, %v3380_v55  ;;  %v4727_v0 = vpack.c.bf16 %v3308_v53, %v3305_v56  ;;  %v3393_v1 = vsub.f32 %v3290_v51, %v3305_v56  ;;  %v4748_v2 = vpack.c.bf16 %v3387_v52, %v3380_v55 }
 0x54b   :  { %v3389_v59 = vand.u32 4294901760, %v3388_v61  ;;  %v3401_v60 = vand.u32 4294901760, %v3400_v62 }
 0x54c   :  { %v3382_v5 = vand.u32 4294901760, %v3381_v63  ;;  %v3394_v7 = vand.u32 4294901760, %v3393_v1  ;;  %4728 = vmatpush3.bf16.msra.mxu1 %v4727_v0  ;;  %v4739_v8 = vpack.c.bf16 %v3400_v62, %v3393_v1 }
 0x54d   :  { %v3402_v9 = vsub.f32 %v3400_v62, %v3401_v60  ;;  %4729 = vmatprep.subr.bf16.mxu1 %v4926_v21 }
 0x54e   :  { %v3395_v10 = vsub.f32 %v3393_v1, %v3394_v7  ;;  %v4730_v4 = vpack.c.bf16 %v3389_v59, %v3382_v5  ;;  %v4751_v6 = vpack.c.bf16 %v3401_v60, %v3394_v7 }
 0x54f   :  { %v3403_v3 = vand.u32 4294901760, %v3402_v9  ;;  %4474 = vmatmul.mubr.f32.vlgmr.msra.gmra.mrb[8].mxu1 %v3371_v58 }
 0x550   :  { %v3396_v12 = vand.u32 4294901760, %v3395_v10  ;;  %4731 = vmatpush3.bf16.msra.mxu1 %v4730_v4  ;;  %4484 = vmatprep.mubr.msk.f32.mxu1 %vm4927_vm3, %v4928_v22 }
 0x551   :  { %4732 = vmatprep.subr.bf16.mxu1 %v4926_v21 }
 0x552   :  { %v4733_v15 = vpack.c.bf16 %v3403_v3, %v3396_v12 }
 0x554   :  { %4734 = vmatpush3.bf16.msra.mxu1 %v4733_v15 }
 0x555   :  { %4735 = vmatprep.subr.bf16.mxu1 %v4926_v21 }
 0x557   :  { %4485 = vmatmul.mubr.f32.vlgmr.msra.gmra.mrb[8].mxu1 %v5450_v29 }
 0x558   :  { %4737 = vmatpush3.bf16.msra.mxu1 %v4736_v57  ;;  %4495 = vmatprep.mubr.msk.f32.mxu1 %vm4927_vm3, %v4928_v22 }
 0x559   :  { %4738 = vmatprep.subr.bf16.mxu1 %v4926_v21 }
 0x55c   :  { %4740 = vmatpush3.bf16.msra.mxu1 %v4739_v8 }
 0x55d   :  { %4741 = vmatprep.subr.bf16.mxu1 %v4926_v21 }
 0x55f   :  { %4496 = vmatmul.mubr.f32.vlgmr.msra.gmra.mrb[8].mxu1 %v5453_v34 }
 0x560   :  { %4743 = vmatpush3.bf16.msra.mxu1 %v4724_v49  ;;  %4506 = vmatprep.mubr.msk.f32.mxu1 %vm4927_vm3, %v4928_v22 }
 0x561   :  { %4744 = vmatprep.subr.bf16.mxu1 %v4926_v21 }
 0x564   :  { %4746 = vmatpush3.bf16.msra.mxu1 %v4727_v0 }
 0x565   :  { %4747 = vmatprep.subr.bf16.mxu1 %v4926_v21 }
 0x567   :  { %4507 = vmatmul.mubr.f32.vlgmr.msra.gmra.mrb[8].mxu1 %v3369_v44 }
 0x568   :  { %4749 = vmatpush3.bf16.msra.mxu1 %v4748_v2  ;;  %4517 = vmatprep.mubr.msk.f32.mxu1 %vm4927_vm3, %v4928_v22 }
 0x569   :  { %4750 = vmatprep.subr.bf16.mxu1 %v4926_v21 }
 0x56c   :  { %4752 = vmatpush3.bf16.msra.mxu1 %v4751_v6 }
 0x56d   :  { %4753 = vmatprep.subr.bf16.mxu1 %v4926_v21 }
 0x56f   :  { %4518 = vmatmul.mubr.f32.vlgmr.msra.gmra.mrb[8].mxu1 %v5450_v29 }
 0x570   :  { %4755 = vmatpush3.bf16.msra.mxu1 %v4724_v49  ;;  %4528 = vmatprep.mubr.msk.f32.mxu1 %vm4927_vm3, %v4928_v22 }
 0x571   :  { %4756 = vmatprep.subr.bf16.mxu1 %v4926_v21 }
 0x574   :  { %4758 = vmatpush3.bf16.msra.mxu1 %v4727_v0 }
 0x577   :  { %4529 = vmatmul.mubr.f32.vlgmr.msra.gmra.mrb[8].mxu1 %v5450_v29 }
 0x64a   :  { %v3779_v17 = vpop.f32.mrb[8].mxu1 }
 0x64b   :  { %v4779_v18 = vadd.f32 %v3779_v17, %v3294_v16  ;;  %v4530_v13 = vpop.f32.mrb[9].mxu1 }
 0x64d   :  { %v3828_v14 = vmul.f32 -1.442695, %v4779_v18 }
 0x64f   :  { %4897 = vpow2.f32 %v3828_v14 }
 0x659   :  { %v4898_v11 = vpop.eup %4897 }
 0x65a   :  { %v3786_v20 = vadd.f32 1.0, %v4898_v11 }
 0x65c   :  { %4899 = vrcp.f32 %v3786_v20 }
 0x666   :  { %v4900_v23 = vpop.eup %4899 }
 0x667   :  { %3789 = vst [vmem:[#allocation3] sm:$0x1] %v4900_v23 }
 0x668   :  { %4912 = shalt.err (!%p4909_p4)
}
 0x669   :  { %s4913_s9 = scalar_lea.hbm %s5504_s7, 16 }
 0x66a   :  { %p4914_p5 = scmp.ne.s32.totalorder %s5504_s7, %s4913_s9  ;;  %p4917_p6 = scmp.lt.u32.totalorder %s4913_s9, %s5504_s7 }
 0x66c   :  { %p4919_p7 = pnand %p4917_p6, %p4914_p5 }
 0x66e   :  { %4922 = shalt.err (!%p4919_p7)
}
 0x66f   :  { %3799 = dma.vmem_to_hbm [thread:$0]  %s3797_s29, 16, %s5504_s7, [#allocation4]  }
 0x670   :  { %4923 = dma.done.wait [#allocation4], 16  }
 0x671   :  { %4924 = vsyncadd [#allocation4], 4294967280 }
 0x672   :  { %3803 = vsyncpa [#allocation4], 1 }

</bundles_post_ra>
